<compile_context>
chip_gen: v6e
topology: v6e:2x2x1
jax: 0.10.0
libtpu: 0.0.40
codegen_flags: <defaults>
</compile_context>

<pallas_src>
import jax
import jax.numpy as jnp
from jax.experimental import pallas as pl
from jax.experimental.pallas import tpu as pltpu


# -----------------------------------------------------------------------------
# Pallas kernel: identity / pass-through of one row-tile.
# -----------------------------------------------------------------------------
def _copy_kernel(x_ref, o_ref):
    # Forward semantics of the module: o = x.
    o_ref[...] = x_ref[...]


def _choose_row_tile(num_rows: int, row_bytes: int, budget_bytes: int) -> int:
    """Largest row tile (multiple of 8, divisor of num_rows) under the budget,
    or the full extent if everything fits / no valid divisor exists."""
    if num_rows * row_bytes <= budget_bytes:
        return num_rows
    max_rows = int(budget_bytes // max(row_bytes, 1))
    max_rows -= max_rows % 8
    max_rows = max(8, max_rows)
    tile = num_rows  # fallback: full extent (always legal for BlockSpec)
    m = max_rows
    while m >= 8:
        if num_rows % m == 0:
            tile = m
            break
        m -= 8
    return tile


def transformer_forward(x: jax.Array) -> jax.Array:
    """Pallas implementation of Transformer.forward (identity)."""
    n, t, d = x.shape
    num_rows = n * t
    x2 = x.reshape(num_rows, d)  # lane-dense 2-D slab: feature axis -> lanes

    itemsize = jnp.dtype(x.dtype).itemsize
    # ~2 MiB per block -> 2 (in bufs) + 2 (out bufs) = ~8 MiB, fits all gens.
    tile_m = _choose_row_tile(num_rows, d * itemsize, budget_bytes=2 << 20)
    grid = (num_rows // tile_m,)

    out2 = pl.pallas_call(
        _copy_kernel,
        out_shape=jax.ShapeDtypeStruct((num_rows, d), x.dtype),
        grid=grid,
        in_specs=[pl.BlockSpec((tile_m, d), lambda i: (i, 0))],
        out_specs=pl.BlockSpec((tile_m, d), lambda i: (i, 0)),
        input_output_aliases={0: 0},  # identity: reuse the input buffer
        compiler_params=pltpu.CompilerParams(
            dimension_semantics=("parallel",),
            vmem_limit_bytes=32 << 20,
        ),
    )(x2)
    return out2.reshape(n, t, d)


# -----------------------------------------------------------------------------
# Module wrapper: deterministic parameter init mirroring __init__ shapes.
# -----------------------------------------------------------------------------
class Transformer:
    def __init__(self, d_model: int, num_heads: int, head_dims: int, key=None):
        if key is None:
            key = jax.random.PRNGKey(0)
        k_w, k_b = jax.random.split(key)
        out_features = num_heads * head_dims
        # nn.Linear(d_model, num_heads * head_dims): declared in __init__ but
        # never used in forward — kept only for parameter-surface fidelity.
        bound = 1.0 / (d_model ** 0.5)
        self.linear_w = jax.random.uniform(
            k_w, (out_features, d_model), jnp.float32, -bound, bound)
        self.linear_b = jax.random.uniform(
            k_b, (out_features,), jnp.float32, -bound, bound)
        # TODO(synk): self.Encoder / self.Decoder are bare class references in
        # the original module (never instantiated or called), so they contribute
        # no compute to forward and are intentionally omitted here.

    def __call__(self, x: jax.Array) -> jax.Array:
        # PyTorch forward: `return x` — identity, routed through the Pallas kernel.
        return transformer_forward(x)


# -----------------------------------------------------------------------------
# Demo / smoke test.
# -----------------------------------------------------------------------------
if __name__ == "__main__":
    key = jax.random.PRNGKey(0)
    k_param, k_x = jax.random.split(key)

    d_model, num_heads, head_dims = 32, 4, 8
    batch, seq = 2, 8

    model = Transformer(d_model, num_heads, head_dims, key=k_param)

    x = jax.random.normal(k_x, (batch, seq, d_model), dtype=jnp.float32)

    y = model(x)
    y = jax.block_until_ready(y)

    assert y.shape == x.shape and y.dtype == x.dtype
    assert bool(jnp.allclose(y, x)), "identity forward mismatch"
    print("KERNEL_OK")
</pallas_src>

<mosaic_0001>
module attributes {stable_mosaic.version = 11 : i64} {
  func.func @_copy_kernel(%arg0: i32, %arg1: memref<16x32xf32, #tpu.memory_space<vmem>>, %arg2: memref<16x32xf32, #tpu.memory_space<vmem>>) attributes {dimension_semantics = [#tpu.dimension_semantics<parallel>], iteration_bounds = array<i64: 1>, scalar_prefetch = 0 : i64, scratch_operands = 0 : i64, tpu.core_type = #tpu.core_type<tc>, window_params = [{transform_indices = @transform_0, window_bounds = array<i64: 16, 32>}, {transform_indices = @transform_1, window_bounds = array<i64: 16, 32>}]} {
    %c0 = arith.constant 0 : index
    %c0_0 = arith.constant 0 : index
    %0 = vector.load %arg1[%c0, %c0_0] : memref<16x32xf32, #tpu.memory_space<vmem>>, vector<16x32xf32>
    %c0_1 = arith.constant 0 : index
    %c0_2 = arith.constant 0 : index
    %1 = vector.load %arg2[%c0_1, %c0_2] : memref<16x32xf32, #tpu.memory_space<vmem>>, vector<16x32xf32>
    tpu.vector_store %arg2[%c0_1, %c0_2], %0 {strides = array<i32>} : memref<16x32xf32, #tpu.memory_space<vmem>>, vector<16x32xf32>,
    return
  }
  func.func @transform_0(%arg0: i32) -> (i32, i32) {
    %c0_i32 = arith.constant 0 : i32
    %c0_i32_0 = arith.constant 0 : i32
    return %arg0, %c0_i32 : i32, i32
  }
  func.func @transform_1(%arg0: i32) -> (i32, i32) {
    %c0_i32 = arith.constant 0 : i32
    %c0_i32_0 = arith.constant 0 : i32
    return %arg0, %c0_i32 : i32, i32
  }
}

</mosaic_0001>

<bundles_post_ra>
// kernel: tpu_custom_call.1
= control target key start
LH: loop header
LB: loop body
LE: loop exit
PB: predicated region body
PF: predicated region fallthrough
CT: control target
= control target key end

     0   :  { %6 = vsyncpa [#allocation3], 0  ;;  %s113_s0 = inlined_call_operand.hbm [shape: f32[16,32], index: 0, kind: input, shape index: {}, may-alias: {0,1}]   ;;  %s114_s1 = inlined_call_operand.hbm [shape: f32[16,32], index: 1, kind: output, shape index: {}, may-alias: {0,1}]  }
   0x1   :  { %7 = vsyncpa [#allocation4], 0  ;;  %s93_s6 = smov [#allocation2]  }
   0x2   :  { %s13_s7 = sshll.u32 %s93_s6, 4  ;;  %s14_s7 = int_to_ptr.vmem [resolvable:$true] %s13_s7 }
   0x3   :  { %s57_s8 = scalar_lea.vmem %s14_s7, 256  ;;  %p62_p1 = scmp.lt.s32.totalorder %s14_s7, %s14_s7 }
   0x4   :  { %p58_p0 = scmp.ne.s32.totalorder %s14_s7, %s57_s8  ;;  %p63_p2 = scmp.lt.s32.totalorder %s57_s8, %s57_s8 }
   0x6   :  { %p64_p3 = por %p63_p2, %p62_p1 }
   0x8   :  { %p65_p4 = pnand %p64_p3, %p58_p0 }
   0xa   :  { %68 = shalt.err (!%p65_p4)
}
   0xb   :  { %s94_s9 = smov 128   ;;  %s95_s10 = smov 8  }
   0xc   :  { %19 = dma.hbm_to_vmem [thread:$0]  %s113_s0, 256, %s14_s7, [#allocation3], %s94_s9, %s94_s9, %s95_s10  }
   0xd   :  { %89 = dma.done.wait [#allocation3], 256  }
   0xe   :  { %90 = vsyncadd [#allocation3], 4294967040  ;;  %s96_s13 = smov [#allocation5]   ;;  %vm25_vm0 = vcmask 261120   ;;  %v23_v0 = vld [vmem:[#allocation2] sm:$0xff]  ;;  %v24_v1 = vld [vmem:[#allocation2 + $0x8] sm:$0xff] }
   0xf   :  { %s33_s14 = sshll.u32 %s96_s13, 4  ;;  %26 = vst.msk [vmem:[#allocation5] sm:$0xff] %vm25_vm0, %v23_v0  ;;  %27 = vst.msk [vmem:[#allocation5 + $0x8] sm:$0xff] %vm25_vm0, %v24_v1  ;;  %s34_s14 = int_to_ptr.vmem [resolvable:$true] %s33_s14 }
  0x10   :  { %s69_s15 = scalar_lea.vmem %s34_s14, 256  ;;  %p74_p6 = scmp.lt.s32.totalorder %s34_s14, %s34_s14 }
  0x11   :  { %p70_p5 = scmp.ne.s32.totalorder %s34_s14, %s69_s15  ;;  %p75_p7 = scmp.lt.s32.totalorder %s69_s15, %s69_s15 }
  0x13   :  { %p76_p8 = por %p75_p7, %p74_p6 }
  0x15   :  { %p77_p9 = pnand %p76_p8, %p70_p5 }
  0x17   :  { %80 = shalt.err (!%p77_p9)
}
  0x18   :  { %39 = dma.vmem_to_hbm [thread:$0]  %s34_s14, 256, %s114_s1, [#allocation4], %s94_s9, %s94_s9, %s95_s10  }
  0x19   :  { %91 = dma.done.wait [#allocation4], 256  }
  0x1a   :  { %92 = vsyncadd [#allocation4], 4294967040 }
  0x1b   :  { %43 = vsyncpa [#allocation3], 1 }
  0x1c   :  { %44 = vsyncpa [#allocation4], 1 }

</bundles_post_ra>
